<compile_context>
chip_gen: v6e
topology: v6e:2x2x1
jax: 0.10.0
libtpu: 0.0.40
codegen_flags: <defaults>
</compile_context>

<pallas_src>
import functools

import jax
import jax.numpy as jnp
from jax import lax
from jax.experimental import pallas as pl
from jax.experimental.pallas import tpu as pltpu


# ---------------------------------------------------------------------------
# Fused kernel: encoder + rel-selected gamma-norm score + sigmoid
# ---------------------------------------------------------------------------
def fused_encode_score_kernel(e_ref, w_ref, b_ref, lhs_t_ref, c_ref,
                              ent_ref, pred_t_ref):
    # e_ref      : (tn, I)       entity tile of init_embed (f32)
    # w_ref      : (I, KD2)      pca weight                (resident)
    # b_ref      : (1, KD2)      pca bias                  (resident)
    # lhs_t_ref  : (2*KD2, B)    concat(2*objK, -ohD).T    (resident)
    # c_ref      : (1, B)        gamma - ||obj||^2         (resident)
    # ent_ref    : (tn, KD2)     all_ent tile out (bf16 by default)
    # pred_t_ref : (tn, B)       sigmoid(score)^T tile out (f32)

    # --- encoder: tanh(tile @ W + b) ----------------------------------------
    x = jnp.tanh(
        jnp.dot(e_ref[...], w_ref[...], preferred_element_type=jnp.float32)
        + b_ref[...]
    )                                                       # (tn, KD2) f32
    # bf16 writeback of all_ent (halves the dominant HBM store stream); the
    # score below keeps using the f32 value of x for accuracy.
    ent_ref[...] = x.astype(ent_ref.dtype)

    # --- merged rel-selected gamma-norm score -------------------------------
    # [x, x*x] @ [2*objK ; -ohD]^T  ==  2*xy_sel - y2_sel      (per (n, b))
    # Contraction is on x's minor dim and the constant's major dim: canonical
    # MXU orientation, no transpose of the big tile.
    x_cat = jnp.concatenate([x, x * x], axis=-1)            # (tn, 2*KD2)
    s = jnp.dot(x_cat, lhs_t_ref[...],
                preferred_element_type=jnp.float32)          # (tn, B)

    # score = (gamma - ||obj||^2) + 2*xy_sel - y2_sel
    pred_t_ref[...] = jax.nn.sigmoid(s + c_ref[...])


# ---------------------------------------------------------------------------
# Tiling helpers
# ---------------------------------------------------------------------------
def _round_up(x, m):
    return ((x + m - 1) // m) * m


def _vmem_bytes_estimate(tile, i_dim, kd2, b):
    """Rough per-pallas_call VMEM need for a given entity tile (bytes)."""
    # resident constants (assume double-buffered by the pipeline to be safe)
    const_bytes = 2 * 4 * (i_dim * kd2 + kd2 + 2 * kd2 * b + b)
    # double-buffered per-tile DMA buffers: e (f32), ent out (bf16), pred^T (f32)
    io_bytes = 2 * (tile * i_dim * 4 + tile * kd2 * 2 + tile * b * 4)
    # in-kernel f32 temps: x and the concatenated [x, x*x]
    tmp_bytes = 3 * tile * kd2 * 4
    return const_bytes + io_bytes + tmp_bytes


def _pick_ent_tile(n_pad, i_dim, kd2, b, budget_bytes):
    """Largest 128-multiple tile dividing n_pad that fits the VMEM budget and
    leaves >= 4 grid steps (so both v7x TensorCores get work and the final
    writeback DMA overlaps compute); fall back to >= 2, then >= 1 steps."""
    fitting = [t for t in (1024, 512, 256, 128)
               if n_pad % t == 0
               and _vmem_bytes_estimate(t, i_dim, kd2, b) <= budget_bytes]
    if not fitting:
        fitting = [128]
    for min_steps in (4, 2, 1):
        for t in fitting:               # descending
            if n_pad // t >= min_steps:
                return t
    return fitting[-1]


# ---------------------------------------------------------------------------
# Wrapper: full DOZSL_Random.forward (train mode)
# ---------------------------------------------------------------------------
def dozsl_random_forward(sub, rel, init_embed, init_rel, pca_w, pca_b, gamma,
                         *, num_factors, embed_dim, ent_tile=None,
                         ent_dtype=jnp.bfloat16,
                         vmem_budget_bytes=24 * 1024 * 1024):
    N, I = init_embed.shape
    K, D = num_factors, embed_dim
    KD = K * D
    B = sub.shape[0]
    hp = lax.Precision.HIGHEST

    init_embed = init_embed.astype(jnp.float32)
    pca_w = pca_w.astype(jnp.float32)
    pca_b = pca_b.astype(jnp.float32)
    init_rel = init_rel.astype(jnp.float32)

    # --- pad K*D (lane dim) and N (entity dim) to multiples of 128 ----------
    KD2 = _round_up(KD, 128)
    N2 = _round_up(N, 128)
    pca_w_p = jnp.pad(pca_w, ((0, 0), (0, KD2 - KD)))
    pca_b_p = jnp.pad(pca_b, (0, KD2 - KD)).reshape(1, KD2)
    init_embed_p = jnp.pad(init_embed, ((0, N2 - N), (0, 0)))

    # --- tiny side path (B rows only, plain JAX): query obj -----------------
    #   obj = tanh(pca(init_embed[sub]))[:, rel] + init_rel[rel]
    sub_flat = jnp.tanh(jnp.dot(init_embed[sub], pca_w, precision=hp)
                        + pca_b.reshape(1, KD))
    sub_sel = sub_flat.reshape(B, K, D)[jnp.arange(B), rel]      # (B, D)
    obj = sub_sel + init_rel[rel]                                # (B, D)

    # --- fold rel factor selection into one merged contraction constant -----
    oh = jax.nn.one_hot(rel, K, dtype=jnp.float32)               # (B, K)
    objk = (oh[:, :, None] * obj[:, None, :]).reshape(B, KD)     # (B, KD)
    ohd = jnp.repeat(oh, D, axis=1)                              # (B, KD)
    objk_p = jnp.pad(objk, ((0, 0), (0, KD2 - KD)))
    ohd_p = jnp.pad(ohd, ((0, 0), (0, KD2 - KD)))
    # lhs_t[j, b]: first KD2 rows weight x (-> 2*xy), last KD2 weight x*x (-> -y2)
    lhs_t = jnp.concatenate([2.0 * objk_p, -ohd_p], axis=1).T    # (2*KD2, B)
    c_row = (gamma.reshape(1, 1).astype(jnp.float32)
             - jnp.sum(obj * obj, axis=1, keepdims=True)).reshape(1, B)

    # --- tile selection & VMEM budget ----------------------------------------
    if ent_tile is None:
        ent_tile = _pick_ent_tile(N2, I, KD2, B, vmem_budget_bytes)
    assert N2 % ent_tile == 0, "padded entity count must be divisible by tile"
    grid = (N2 // ent_tile,)
    vmem_limit = int(min(max(_vmem_bytes_estimate(ent_tile, I, KD2, B)
                             + (8 << 20), 32 << 20), 64 << 20))

    all_ent_p, pred_t = pl.pallas_call(
        fused_encode_score_kernel,
        out_shape=(jax.ShapeDtypeStruct((N2, KD2), ent_dtype),
                   jax.ShapeDtypeStruct((N2, B), jnp.float32)),
        grid=grid,
        in_specs=[
            pl.BlockSpec((ent_tile, I), lambda i: (i, 0)),   # init_embed tile
            pl.BlockSpec((I, KD2),      lambda i: (0, 0)),   # pca weight (resident)
            pl.BlockSpec((1, KD2),      lambda i: (0, 0)),   # pca bias   (resident)
            pl.BlockSpec((2 * KD2, B),  lambda i: (0, 0)),   # merged const^T
            pl.BlockSpec((1, B),        lambda i: (0, 0)),   # gamma - ||obj||^2
        ],
        out_specs=(
            pl.BlockSpec((ent_tile, KD2), lambda i: (i, 0)),  # all_ent tile (bf16)
            pl.BlockSpec((ent_tile, B),   lambda i: (i, 0)),  # pred^T tile
        ),
        compiler_params=pltpu.CompilerParams(
            dimension_semantics=("parallel",),
            vmem_limit_bytes=vmem_limit),
    )(init_embed_p, pca_w_p, pca_b_p, lhs_t, c_row)

    all_ent = all_ent_p[:N, :KD].reshape(N, K, D)
    pred = pred_t[:N, :].T                                   # (B, N), cheap fixup
    return pred, all_ent


# ---------------------------------------------------------------------------
# Pure-JAX reference for validation
# ---------------------------------------------------------------------------
def reference_forward(sub, rel, init_embed, init_rel, pca_w, pca_b, gamma,
                      *, num_factors, embed_dim):
    hp = lax.Precision.HIGHEST
    x = jnp.tanh(jnp.dot(init_embed, pca_w, precision=hp) + pca_b)
    x = x.reshape(-1, num_factors, embed_dim)
    B = sub.shape[0]
    sub_emb = x[sub]
    rel_emb = init_rel[rel]
    sub_sel = sub_emb[jnp.arange(B), rel]
    obj = sub_sel + rel_emb
    obj_emb = jnp.tile(obj, (1, num_factors)).reshape(B, num_factors, embed_dim)
    x2 = jnp.sum(obj_emb * obj_emb, -1)
    y2 = jnp.sum(x * x, -1)
    xy = jnp.einsum('bkf,nkf->bkn', obj_emb, x, precision=hp)
    s = gamma - (x2[:, :, None] + y2.T[None] - 2.0 * xy)
    sel = s[jnp.arange(B), rel]
    return jax.nn.sigmoid(sel), x


if __name__ == "__main__":
    # Shapes deliberately exercise both padding paths (N=500 -> 512,
    # K*D = 4*30 = 120 -> 128) and a multi-step grid (4 entity tiles of 128).
    num_ent = 500
    init_dim = 16
    embed_dim = 30
    num_factors = 4
    num_rel = 8
    batch = 8
    init_gamma = 0.5

    key = jax.random.PRNGKey(0)
    k_e, k_r, k_w, k_b, k_sub, k_rel = jax.random.split(key, 6)

    kd = num_factors * embed_dim

    init_embed = jax.random.normal(k_e, (num_ent, init_dim), jnp.float32) * 0.1
    init_rel = jax.random.normal(k_r, (num_rel, embed_dim), jnp.float32) * 0.1
    # SparseInputLinear.reset_parameters: uniform(-stdv, stdv), stdv=1/sqrt(out_dim)
    stdv = 1.0 / jnp.sqrt(jnp.float32(kd))
    pca_w = jax.random.uniform(k_w, (init_dim, kd), jnp.float32, -stdv, stdv)
    pca_b = jax.random.uniform(k_b, (kd,), jnp.float32, -stdv, stdv)
    gamma = jnp.array(init_gamma, jnp.float32)

    sub = jax.random.randint(k_sub, (batch,), 0, num_ent, jnp.int32)
    # rel indexes both init_rel rows and factor slots (< num_factors), as the
    # original module assumes.
    rel = jax.random.randint(k_rel, (batch,), 0, num_factors, jnp.int32)

    fwd = jax.jit(functools.partial(dozsl_random_forward,
                                    num_factors=num_factors,
                                    embed_dim=embed_dim))
    pred, all_ent = fwd(sub, rel, init_embed, init_rel, pca_w, pca_b, gamma)
    jax.block_until_ready((pred, all_ent))

    ref_pred, ref_ent = reference_forward(
        sub, rel, init_embed, init_rel, pca_w, pca_b, gamma,
        num_factors=num_factors, embed_dim=embed_dim)

    assert pred.shape == (batch, num_ent) and pred.dtype == jnp.float32
    assert all_ent.shape == (num_ent, num_factors, embed_dim)
    # all_ent is intentionally bf16 (HBM-writeback optimization) -> looser tol.
    assert jnp.allclose(all_ent.astype(jnp.float32), ref_ent,
                        atol=8e-3, rtol=1e-2), "all_ent mismatch vs reference"
    # pred is computed from the f32 values inside the kernel.
    assert jnp.allclose(pred, ref_pred, atol=3e-3, rtol=3e-3), \
        "pred mismatch vs reference"
    print("KERNEL_OK")
</pallas_src>

<mosaic_0001>
module attributes {stable_mosaic.version = 11 : i64} {
  func.func @fused_encode_score_kernel(%arg0: i32, %arg1: memref<128x16xf32, #tpu.memory_space<vmem>>, %arg2: memref<16x128xf32, #tpu.memory_space<vmem>>, %arg3: memref<1x128xf32, #tpu.memory_space<vmem>>, %arg4: memref<256x8xf32, #tpu.memory_space<vmem>>, %arg5: memref<1x8xf32, #tpu.memory_space<vmem>>, %arg6: memref<128x128xbf16, #tpu.memory_space<vmem>>, %arg7: memref<128x8xf32, #tpu.memory_space<vmem>>) attributes {dimension_semantics = [#tpu.dimension_semantics<parallel>], iteration_bounds = array<i64: 4>, scalar_prefetch = 0 : i64, scratch_operands = 0 : i64, tpu.core_type = #tpu.core_type<tc>, window_params = [{transform_indices = @transform_0, window_bounds = array<i64: 128, 16>}, {pipeline_mode = #tpu.pipeline_mode<synchronous>, transform_indices = @transform_1, window_bounds = array<i64: 16, 128>}, {pipeline_mode = #tpu.pipeline_mode<synchronous>, transform_indices = @transform_2, window_bounds = array<i64: 1, 128>}, {pipeline_mode = #tpu.pipeline_mode<synchronous>, transform_indices = @transform_3, window_bounds = array<i64: 256, 8>}, {pipeline_mode = #tpu.pipeline_mode<synchronous>, transform_indices = @transform_4, window_bounds = array<i64: 1, 8>}, {transform_indices = @transform_5, window_bounds = array<i64: 128, 128>}, {transform_indices = @transform_6, window_bounds = array<i64: 128, 8>}]} {
    %c0 = arith.constant 0 : index
    %c0_0 = arith.constant 0 : index
    %0 = vector.load %arg1[%c0, %c0_0] : memref<128x16xf32, #tpu.memory_space<vmem>>, vector<128x16xf32>
    %c0_1 = arith.constant 0 : index
    %c0_2 = arith.constant 0 : index
    %1 = vector.load %arg2[%c0_1, %c0_2] : memref<16x128xf32, #tpu.memory_space<vmem>>, vector<16x128xf32>
    %cst = arith.constant dense<0.000000e+00> : vector<128x128xf32>
    %2 = tpu.matmul %0, %1, %cst {dimension_numbers = #tpu.dot_dimension_numbers<[1], [0], [0], [1], [0, 0, 1, 1], [], []>} : vector<128x16xf32>, vector<16x128xf32>, vector<128x128xf32> -> vector<128x128xf32>
    %c0_3 = arith.constant 0 : index
    %c0_4 = arith.constant 0 : index
    %3 = vector.load %arg3[%c0_3, %c0_4] : memref<1x128xf32, #tpu.memory_space<vmem>>, vector<1x128xf32>
    %4 = vector.broadcast %3 : vector<1x128xf32> to vector<128x128xf32>
    %5 = arith.addf %2, %4 : vector<128x128xf32>
    %6 = math.tanh %5 : vector<128x128xf32>
    %7 = arith.truncf %6 : vector<128x128xf32> to vector<128x128xbf16>
    %c0_5 = arith.constant 0 : index
    %c0_6 = arith.constant 0 : index
    %8 = vector.load %arg6[%c0_5, %c0_6] : memref<128x128xbf16, #tpu.memory_space<vmem>>, vector<128x128xbf16>
    tpu.vector_store %arg6[%c0_5, %c0_6], %7 {strides = array<i32>} : memref<128x128xbf16, #tpu.memory_space<vmem>>, vector<128x128xbf16>,
    %9 = arith.mulf %6, %6 : vector<128x128xf32>
    %10 = tpu.concatenate %6, %9 in 1 : vector<128x128xf32>, vector<128x128xf32> -> vector<128x256xf32>
    %c0_7 = arith.constant 0 : index
    %c0_8 = arith.constant 0 : index
    %11 = vector.load %arg4[%c0_7, %c0_8] : memref<256x8xf32, #tpu.memory_space<vmem>>, vector<256x8xf32>
    %cst_9 = arith.constant dense<0.000000e+00> : vector<128x8xf32>
    %12 = tpu.matmul %10, %11, %cst_9 {dimension_numbers = #tpu.dot_dimension_numbers<[1], [0], [0], [1], [0, 0, 1, 1], [], []>} : vector<128x256xf32>, vector<256x8xf32>, vector<128x8xf32> -> vector<128x8xf32>
    %c0_10 = arith.constant 0 : index
    %c0_11 = arith.constant 0 : index
    %13 = vector.load %arg5[%c0_10, %c0_11] : memref<1x8xf32, #tpu.memory_space<vmem>>, vector<1x8xf32>
    %14 = vector.broadcast %13 : vector<1x8xf32> to vector<128x8xf32>
    %15 = arith.addf %12, %14 : vector<128x8xf32>
    %16 = arith.negf %15 : vector<128x8xf32>
    %17 = math.exp %16 : vector<128x8xf32>
    %cst_12 = arith.constant 1.000000e+00 : f32
    %18 = vector.broadcast %cst_12 : f32 to vector<128x8xf32>
    %19 = arith.addf %18, %17 : vector<128x8xf32>
    %20 = arith.divf %18, %19 : vector<128x8xf32>
    %c0_13 = arith.constant 0 : index
    %c0_14 = arith.constant 0 : index
    %21 = vector.load %arg7[%c0_13, %c0_14] : memref<128x8xf32, #tpu.memory_space<vmem>>, vector<128x8xf32>
    tpu.vector_store %arg7[%c0_13, %c0_14], %20 {strides = array<i32>} : memref<128x8xf32, #tpu.memory_space<vmem>>, vector<128x8xf32>,
    return
  }
  func.func @transform_0(%arg0: i32) -> (i32, i32) {
    %c0_i32 = arith.constant 0 : i32
    %c0_i32_0 = arith.constant 0 : i32
    return %arg0, %c0_i32 : i32, i32
  }
  func.func @transform_1(%arg0: i32) -> (i32, i32) {
    %c0_i32 = arith.constant 0 : i32
    %c0_i32_0 = arith.constant 0 : i32
    %c0_i32_1 = arith.constant 0 : i32
    return %c0_i32, %c0_i32_0 : i32, i32
  }
  func.func @transform_2(%arg0: i32) -> (i32, i32) {
    %c0_i32 = arith.constant 0 : i32
    %c0_i32_0 = arith.constant 0 : i32
    %c0_i32_1 = arith.constant 0 : i32
    return %c0_i32, %c0_i32_0 : i32, i32
  }
  func.func @transform_3(%arg0: i32) -> (i32, i32) {
    %c0_i32 = arith.constant 0 : i32
    %c0_i32_0 = arith.constant 0 : i32
    %c0_i32_1 = arith.constant 0 : i32
    return %c0_i32, %c0_i32_0 : i32, i32
  }
  func.func @transform_4(%arg0: i32) -> (i32, i32) {
    %c0_i32 = arith.constant 0 : i32
    %c0_i32_0 = arith.constant 0 : i32
    %c0_i32_1 = arith.constant 0 : i32
    return %c0_i32, %c0_i32_0 : i32, i32
  }
  func.func @transform_5(%arg0: i32) -> (i32, i32) {
    %c0_i32 = arith.constant 0 : i32
    %c0_i32_0 = arith.constant 0 : i32
    return %arg0, %c0_i32 : i32, i32
  }
  func.func @transform_6(%arg0: i32) -> (i32, i32) {
    %c0_i32 = arith.constant 0 : i32
    %c0_i32_0 = arith.constant 0 : i32
    return %arg0, %c0_i32 : i32, i32
  }
}

</mosaic_0001>

<bundles_post_ra>
// kernel: mul.0
= control target key start
LH: loop header
LB: loop body
LE: loop exit
PB: predicated region body
PF: predicated region fallthrough
CT: control target
= control target key end

     0   :  { %s34_s0 = inlined_call_operand.vmem [shape: f32[8,120], index: 0, kind: input, shape index: {}]   ;;  %s35_s1 = inlined_call_operand.vmem [shape: f32[8,120], index: 1, kind: input, shape index: {}]   ;;  %s36_s2 = inlined_call_operand.vmem [shape: f32[8,120], index: 2, kind: output, shape index: {}]  }
   0x1   :  { %v3_v0 = vld [vmem:[%s34_s0] sm:$0xff] }
   0x2   :  { %v4_v1 = vld [vmem:[%s35_s1] sm:$0xff] }
   0x3   :  { %v7_v2 = vmul.f32 %v4_v1, %v3_v0 }
   0x5   :  { %9 = vst [vmem:[%s36_s2] sm:$0xff] %v7_v2 }

// kernel: dozsl_random_forward.1
= control target key start
LH: loop header
LB: loop body
LE: loop exit
PB: predicated region body
PF: predicated region fallthrough
CT: control target
= control target key end

     0   :  { %s1418_s21 = smov 0   ;;  %s1668_s0 = inlined_call_operand.vmem [shape: f32[512,16], index: 0, kind: input, shape index: {}]   ;;  %s1669_s1 = inlined_call_operand.vmem [shape: f32[16,128], index: 1, kind: input, shape index: {}]   ;;  %s1670_s2 = inlined_call_operand.vmem [shape: f32[1,128], index: 2, kind: input, shape index: {}]   ;;  %s1671_s3 = inlined_call_operand.vmem [shape: f32[256,8], index: 3, kind: input, shape index: {}]   ;;  %s1672_s4 = inlined_call_operand.vmem [shape: f32[1,8], index: 4, kind: input, shape index: {}]   ;;  %s1673_s5 = inlined_call_operand.vmem [shape: bf16[512,128], index: 5, kind: output, shape index: {0}]   ;;  %s1674_s6 = inlined_call_operand.vmem [shape: f32[512,8], index: 6, kind: output, shape index: {1}]  }
   0x1 LB: > { %s987_s22 = sadd.s32 4294967295, %s1381_s21   ;;  %p991_p0 = scmp.ge.s32.totalorder %s1381_s21, 1  ;;  %s1381_s21 = sphi %s1418_s21, %s17_s21  }
   0x2   : > { %p216_p1 = scmp.lt.s32.totalorder %s1381_s21, 5 }
   0x4   : > { %p217_p2 = pnand %p991_p0, %p216_p1 }
   0x5   : > { %s992_s27 = sshll.u32 (!%p217_p2), %s987_s22, 4 }
   0x6   : > { %220 = sbr.rel (%p217_p2) target bundleno = 509 (0x1fd), region = 40  ;;  %p252_p3 = scmp.lt.s32.totalorder (!%p217_p2), %s992_s27, 63 }
   0xb   : > { %v286_v0 = vld [vmem:[%s1669_s1 + $0x8] sm:$0xff]  ;;  %v285_v1 = vld [vmem:[%s1669_s1] sm:$0xff]  ;;  %v631_v2 = vld [vmem:[%s1671_s3 + $0xf8] sm:$0xff]  ;;  %s1676_s27 = smov (!%p252_p3, %s992_s27), 63  ;;  %vm294_vm0 = vcmask 130048   ;;  %vm880_vm1 = vcmask 64512  }
   0xc   : > { %1211 = vmatprep.subr.mxu0 %v286_v0  ;;  %v615_v3 = vld [vmem:[%s1671_s3 + $0x78] sm:$0xff]  ;;  %1239 = vmatprep.subr.mxu1 %v631_v2  ;;  %v630_v4 = vld [vmem:[%s1671_s3 + $0xf0] sm:$0xff]  ;;  %v629_v6 = vld [vmem:[%s1671_s3 + $0xe8] sm:$0xff]  ;;  %s993_s14 = sshll.u32 %s1676_s27, 3  ;;  %s995_s10 = sshll.u32 %s1676_s27, 2 }
   0xd   : > { %1212 = vmatpush3.msra.mxu0 %v286_v0  ;;  %1255 = vmatpush3.msra.mxu1 %v615_v3  ;;  %v614_v5 = vld [vmem:[%s1671_s3 + $0x70] sm:$0xff]  ;;  %v613_v7 = vld [vmem:[%s1671_s3 + $0x68] sm:$0xff]  ;;  %s1458_s19 = scalar_lea.vmem %s1668_s0, %s993_s14  ;;  %v628_v8 = vld [vmem:[%s1671_s3 + $0xe0] sm:$0xff]  ;;  %s1588_s13 = scalar_lea.vmem %s1673_s5, %s995_s10 }
   0xe   : > { %1213 = vmatprep.subr.mxu0 %v285_v1  ;;  %1240 = vmatprep.subr.mxu1 %v630_v4  ;;  %v612_v9 = vld [vmem:[%s1671_s3 + $0x60] sm:$0xff]  ;;  %v270_v11 = vld [vmem:[%s1458_s19 + $0x8] sm:$0xff]  ;;  %v271_v12 = vld [vmem:[%s1458_s19 + $0x10] sm:$0xff] }
   0xf   : > { %1214 = vmatpush3.msra.mxu0 %v285_v1  ;;  %1256 = vmatpush3.msra.mxu1 %v614_v5  ;;  %v269_v10 = vld [vmem:[%s1458_s19] sm:$0xff]  ;;  %v627_v13 = vld [vmem:[%s1671_s3 + $0xd8] sm:$0xff]  ;;  %v274_v17 = vld [vmem:[%s1458_s19 + $0x28] sm:$0xff] }
  0x10   : > { %1131 = vmatprep.subr.mxu0 %v631_v2  ;;  %1241 = vmatprep.subr.mxu1 %v629_v6  ;;  %v272_v14 = vld [vmem:[%s1458_s19 + $0x18] sm:$0xff]  ;;  %v273_v16 = vld [vmem:[%s1458_s19 + $0x20] sm:$0xff]  ;;  %v275_v18 = vld [vmem:[%s1458_s19 + $0x30] sm:$0xff] }
  0x11   : > { %1257 = vmatpush3.msra.mxu1 %v613_v7  ;;  %1215 = vmatprep.mubr.msk.f32.mxu0 %vm294_vm0, %v269_v10  ;;  %v611_v15 = vld [vmem:[%s1671_s3 + $0x58] sm:$0xff]  ;;  %v277_v20 = vld [vmem:[%s1458_s19 + $0x40] sm:$0xff]  ;;  %v278_v21 = vld [vmem:[%s1458_s19 + $0x48] sm:$0xff] }
  0x12   : > { %1242 = vmatprep.subr.mxu1 %v628_v8  ;;  %1216 = vmatmul.mubr.msk.f32.vlgmr.msra.gmra.mxu0 %vm294_vm0, %v270_v11  ;;  %v276_v19 = vld [vmem:[%s1458_s19 + $0x38] sm:$0xff]  ;;  %v279_v22 = vld [vmem:[%s1458_s19 + $0x50] sm:$0xff]  ;;  %v281_v24 = vld [vmem:[%s1458_s19 + $0x60] sm:$0xff] }
  0x13   : > { %1258 = vmatpush3.msra.mxu1 %v612_v9  ;;  %1218 = vmatprep.mubr.msk.f32.mxu0 %vm294_vm0, %v271_v12  ;;  %v280_v23 = vld [vmem:[%s1458_s19 + $0x58] sm:$0xff]  ;;  %v282_v25 = vld [vmem:[%s1458_s19 + $0x68] sm:$0xff]  ;;  %v283_v26 = vld [vmem:[%s1458_s19 + $0x70] sm:$0xff] }
  0x14   : > { %1243 = vmatprep.subr.mxu1 %v627_v13  ;;  %1132 = vmatpush3.msra.mxu0 %v615_v3  ;;  %v284_v27 = vld [vmem:[%s1458_s19 + $0x78] sm:$0xff]  ;;  %v626_v28 = vld [vmem:[%s1671_s3 + $0xd0] sm:$0xff]  ;;  %v625_v30 = vld [vmem:[%s1671_s3 + $0xc8] sm:$0xff]  ;;  %s1627_s19 = scalar_lea.vmem %s1674_s6, %s993_s14 }
  0x15   : > { %1133 = vmatprep.subr.mxu0 %v630_v4  ;;  %1259 = vmatpush3.msra.mxu1 %v611_v15  ;;  %v610_v29 = vld [vmem:[%s1671_s3 + $0x50] sm:$0xff]  ;;  %v609_v31 = vld [vmem:[%s1671_s3 + $0x48] sm:$0xff]  ;;  %v624_v32 = vld [vmem:[%s1671_s3 + $0xc0] sm:$0xff] }
  0x16   : > { %1134 = vmatpush3.msra.mxu0 %v614_v5  ;;  %1244 = vmatprep.subr.mxu1 %v626_v28  ;;  %v608_v33 = vld [vmem:[%s1671_s3 + $0x40] sm:$0xff]  ;;  %v623_v34 = vld [vmem:[%s1671_s3 + $0xb8] sm:$0xff]  ;;  %v622_v36 = vld [vmem:[%s1671_s3 + $0xb0] sm:$0xff] }
  0x17   : > { %1219 = vmatmul.mubr.msk.f32.gmra.mxu0 %vm294_vm0, %v272_v14  ;;  %1135 = vmatprep.subr.mxu0 %v629_v6  ;;  %v607_v35 = vld [vmem:[%s1671_s3 + $0x38] sm:$0xff]  ;;  %v606_v37 = vld [vmem:[%s1671_s3 + $0x30] sm:$0xff]  ;;  %v621_v38 = vld [vmem:[%s1671_s3 + $0xa8] sm:$0xff] }
  0x18   : > { %1221 = vmatprep.mubr.msk.f32.mxu0 %vm294_vm0, %v273_v16  ;;  %1136 = vmatpush3.msra.mxu0 %v613_v7  ;;  %v605_v39 = vld [vmem:[%s1671_s3 + $0x28] sm:$0xff]  ;;  %v620_v40 = vld [vmem:[%s1671_s3 + $0xa0] sm:$0xff]  ;;  %v619_v42 = vld [vmem:[%s1671_s3 + $0x98] sm:$0xff] }
  0x19   : > { %1137 = vmatprep.subr.mxu0 %v628_v8  ;;  %1260 = vmatpush3.msra.mxu1 %v610_v29  ;;  %v604_v41 = vld [vmem:[%s1671_s3 + $0x20] sm:$0xff]  ;;  %v603_v43 = vld [vmem:[%s1671_s3 + $0x18] sm:$0xff]  ;;  %v618_v44 = vld [vmem:[%s1671_s3 + $0x90] sm:$0xff] }
  0x1a   : > { %1138 = vmatpush3.msra.mxu0 %v612_v9  ;;  %1245 = vmatprep.subr.mxu1 %v625_v30  ;;  %v602_v45 = vld [vmem:[%s1671_s3 + $0x10] sm:$0xff]  ;;  %v617_v46 = vld [vmem:[%s1671_s3 + $0x88] sm:$0xff]  ;;  %v616_v48 = vld [vmem:[%s1671_s3 + $0x80] sm:$0xff] }
  0x1b   : > { %1222 = vmatmul.mubr.msk.f32.gmra.mxu0 %vm294_vm0, %v274_v17  ;;  %1139 = vmatprep.subr.mxu0 %v627_v13  ;;  %v601_v47 = vld [vmem:[%s1671_s3 + $0x8] sm:$0xff]  ;;  %v600_v49 = vld [vmem:[%s1671_s3] sm:$0xff] }
  0x1c   : > { %1224 = vmatprep.mubr.msk.f32.mxu0 %vm294_vm0, %v275_v18  ;;  %1140 = vmatpush3.msra.mxu0 %v611_v15  ;;  %v1573_v50 = vld [vmem:[%s1670_s2] ss:$0 sm:$0xff] }
  0x1d   : > { %1141 = vmatprep.subr.mxu0 %v626_v28  ;;  %1261 = vmatpush3.msra.mxu1 %v609_v31 }
  0x1e   : > { %1142 = vmatpush3.msra.mxu0 %v610_v29  ;;  %1246 = vmatprep.subr.mxu1 %v624_v32 }
  0x1f   : > { %1225 = vmatmul.mubr.msk.f32.gmra.mxu0 %vm294_vm0, %v276_v19  ;;  %1143 = vmatprep.subr.mxu0 %v625_v30 }
  0x20   : > { %1227 = vmatprep.mubr.msk.f32.mxu0 %vm294_vm0, %v277_v20  ;;  %1144 = vmatpush3.msra.mxu0 %v609_v31 }
  0x21   : > { %1145 = vmatprep.subr.mxu0 %v624_v32  ;;  %1262 = vmatpush3.msra.mxu1 %v608_v33 }
  0x22   : > { %1146 = vmatpush3.msra.mxu0 %v608_v33  ;;  %1247 = vmatprep.subr.mxu1 %v623_v34 }
  0x23   : > { %1228 = vmatmul.mubr.msk.f32.gmra.mxu0 %vm294_vm0, %v278_v21  ;;  %1147 = vmatprep.subr.mxu0 %v623_v34 }
  0x24   : > { %1230 = vmatprep.mubr.msk.f32.mxu0 %vm294_vm0, %v279_v22  ;;  %1148 = vmatpush3.msra.mxu0 %v607_v35 }
  0x25   : > { %1263 = vmatpush3.msra.mxu1 %v607_v35  ;;  %1149 = vmatprep.subr.mxu0 %v622_v36 }
  0x26   : > { %1248 = vmatprep.subr.mxu1 %v622_v36  ;;  %1150 = vmatpush3.msra.mxu0 %v606_v37 }
  0x27   : > { %1231 = vmatmul.mubr.msk.f32.gmra.mxu0 %vm294_vm0, %v280_v23  ;;  %1264 = vmatpush3.msra.mxu1 %v606_v37 }
  0x28   : > { %1233 = vmatprep.mubr.msk.f32.mxu0 %vm294_vm0, %v281_v24  ;;  %1151 = vmatprep.subr.mxu0 %v621_v38 }
  0x29   : > { %1249 = vmatprep.subr.mxu1 %v621_v38  ;;  %1152 = vmatpush3.msra.mxu0 %v605_v39 }
  0x2a   : > { %1265 = vmatpush3.msra.mxu1 %v605_v39  ;;  %1153 = vmatprep.subr.mxu0 %v620_v40 }
  0x2b   : > { %1234 = vmatmul.mubr.msk.f32.gmra.mxu0 %vm294_vm0, %v282_v25  ;;  %1250 = vmatprep.subr.mxu1 %v620_v40 }
  0x2c   : > { %1236 = vmatprep.mubr.msk.f32.mxu0 %vm294_vm0, %v283_v26  ;;  %1154 = vmatpush3.msra.mxu0 %v604_v41 }
  0x2d   : > { %1266 = vmatpush3.msra.mxu1 %v604_v41  ;;  %1155 = vmatprep.subr.mxu0 %v619_v42 }
  0x2e   : > { %1251 = vmatprep.subr.mxu1 %v619_v42  ;;  %1156 = vmatpush3.msra.mxu0 %v603_v43 }
  0x2f   : > { %1237 = vmatmul.mubr.msk.f32.gmra.mxu0 %vm294_vm0, %v284_v27  ;;  %1267 = vmatpush3.msra.mxu1 %v603_v43 }
  0x30   : > { %1157 = vmatprep.subr.mxu0 %v618_v44  ;;  %1252 = vmatprep.subr.mxu1 %v618_v44 }
  0x31   : > { %1158 = vmatpush3.msra.mxu0 %v602_v45  ;;  %1268 = vmatpush3.msra.mxu1 %v602_v45 }
  0x32   : > { %1159 = vmatprep.subr.mxu0 %v617_v46  ;;  %1253 = vmatprep.subr.mxu1 %v617_v46 }
  0x33   : > { %1160 = vmatpush3.msra.mxu0 %v601_v47  ;;  %1269 = vmatpush3.msra.mxu1 %v601_v47 }
  0x34   : > { %1161 = vmatprep.subr.mxu0 %v616_v48  ;;  %1254 = vmatprep.subr.mxu1 %v616_v48 }
  0x35   : > { %1162 = vmatpush3.msra.mxu0 %v600_v49  ;;  %1270 = vmatpush3.msra.mxu1 %v600_v49 }
  0xd2   : > { %v1217_v51 = vpop.f32.mrf.mxu0 }
  0xd3   : > { %v415_v52 = vadd.f32 %v1217_v51, %v1573_v50 }
  0xd4   : > { %v409_v53 = vpop.f32.mrf.mxu0 }
  0xd5   : > { %v410_v54 = vadd.f32 %v1573_v50, %v409_v53  ;;  %1279 = vtanh.f32 %v415_v52 }
  0xd7   : > { %v1220_v55 = vpop.f32.mrf.mxu0  ;;  %1281 = vtanh.f32 %v410_v54 }
  0xd8   : > { %v425_v56 = vadd.f32 %v1220_v55, %v1573_v50 }
  0xd9   : > { %v419_v57 = vpop.f32.mrf.mxu0 }
  0xda   : > { %v420_v58 = vadd.f32 %v1573_v50, %v419_v57  ;;  %1283 = vtanh.f32 %v425_v56 }
  0xdb   : > { %v1223_v59 = vpop.f32.mrf.mxu0 }
  0xdc   : > { %1285 = vtanh.f32 %v420_v58  ;;  %v435_v60 = vadd.f32 %v1223_v59, %v1573_v50 }
  0xdd   : > { %v429_v61 = vpop.f32.mrf.mxu0 }
  0xde   : > { %v430_v62 = vadd.f32 %v1573_v50, %v429_v61  ;;  %1287 = vtanh.f32 %v435_v60  ;;  %v1608_v60 = vld [vmem:[%s1672_s4] ss:$0 sm:$0xff] }
  0xdf   : > { %v1226_v63 = vpop.f32.mrf.mxu0 }
  0xe0   : > { %1289 = vtanh.f32 %v430_v62  ;;  %v445_v0 = vadd.f32 %v1226_v63, %v1573_v50 }
  0xe1   : > { %v439_v1 = vpop.f32.mrf.mxu0 }
  0xe2   : > { %1291 = vtanh.f32 %v445_v0  ;;  %v440_v2 = vadd.f32 %v1573_v50, %v439_v1  ;;  %v1280_v4 = vpop.eup %1279 }
  0xe3   : > { %v1229_v3 = vpop.f32.mrf.mxu0  ;;  %v585_v14 = vmul.f32 %v1280_v4, %v1280_v4 }
  0xe4   : > { %1293 = vtanh.f32 %v440_v2  ;;  %v455_v5 = vadd.f32 %v1229_v3, %v1573_v50  ;;  %v1282_v6 = vpop.eup %1281 }
  0xe5   : > { %v449_v7 = vpop.f32.mrf.mxu0  ;;  %v1069_v8 = vpack.c.bf16 %v1280_v4, %v1282_v6  ;;  %v584_v10 = vmul.f32 %v1282_v6, %v1282_v6 }
  0xe6   : > { %v450_v9 = vadd.f32 %v1573_v50, %v449_v7  ;;  %1295 = vtanh.f32 %v455_v5 }
  0xe7   : > { %v1232_v11 = vpop.f32.mrf.mxu0  ;;  %v1284_v12 = vpop.eup %1283  ;;  %1070 = vst [vmem:[%s1588_s13] sm:$0xff] %v1069_v8   ;;  %703 = vmatprep.mubr.f32.mxu0 %v584_v10 }
  0xe8   : > { %1297 = vtanh.f32 %v450_v9  ;;  %v465_v13 = vadd.f32 %v1232_v11, %v1573_v50  ;;  %704 = vmatmul.mubr.f32.vlgmr.msra.gmra.mxu0 %v1282_v6  ;;  %v587_v29 = vmul.f32 %v1284_v12, %v1284_v12 }
  0xe9   : > { %v1286_v15 = vpop.eup %1285  ;;  %v459_v16 = vpop.f32.mrf.mxu0  ;;  %708 = vmatprep.mubr.f32.mxu0 %v585_v14 }
  0xea   : > { %v1074_v17 = vpack.c.bf16 %v1284_v12, %v1286_v15  ;;  %1299 = vtanh.f32 %v465_v13  ;;  %v460_v18 = vadd.f32 %v1573_v50, %v459_v16  ;;  %v586_v21 = vmul.f32 %v1286_v15, %v1286_v15 }
  0xeb   : > { %v1235_v19 = vpop.f32.mrf.mxu0  ;;  %v1288_v20 = vpop.eup %1287 }
  0xec   : > { %1106 = vst [vmem:[%s1588_s13 + $0x8] sm:$0xff] %v1074_v17   ;;  %1301 = vtanh.f32 %v460_v18  ;;  %v475_v22 = vadd.f32 %v1235_v19, %v1573_v50  ;;  %709 = vmatmul.mubr.f32.gmra.mxu0 %v1280_v4  ;;  %v589_v42 = vmul.f32 %v1288_v20, %v1288_v20 }
  0xed   : > { %v1290_v23 = vpop.eup %1289  ;;  %v469_v24 = vpop.f32.mrf.mxu0  ;;  %713 = vmatprep.mubr.f32.mxu0 %v586_v21 }
  0xee   : > { %v1079_v25 = vpack.c.bf16 %v1288_v20, %v1290_v23  ;;  %1303 = vtanh.f32 %v475_v22  ;;  %v470_v26 = vadd.f32 %v1573_v50, %v469_v24  ;;  %v588_v37 = vmul.f32 %v1290_v23, %v1290_v23 }
  0xef   : > { %v1292_v27 = vpop.eup %1291  ;;  %v1238_v28 = vpop.f32.mrf.mxu0 }
  0xf0   : > { %1107 = vst [vmem:[%s1588_s13 + $0x10] sm:$0xff] %v1079_v25   ;;  %v591_v30 = vmul.f32 %v1292_v27, %v1292_v27  ;;  %1305 = vtanh.f32 %v470_v26  ;;  %v485_v31 = vadd.f32 %v1238_v28, %v1573_v50  ;;  %714 = vmatmul.mubr.f32.gmra.mxu0 %v1286_v15 }
  0xf1   : > { %v1294_v32 = vpop.eup %1293  ;;  %v479_v33 = vpop.f32.mrf.mxu0  ;;  %718 = vmatprep.mubr.f32.mxu0 %v587_v29 }
  0xf2   : > { %v1084_v34 = vpack.c.bf16 %v1292_v27, %v1294_v32  ;;  %738 = vmatprep.mubr.f32.mxu1 %v591_v30  ;;  %1307 = vtanh.f32 %v485_v31  ;;  %v480_v35 = vadd.f32 %v1573_v50, %v479_v33  ;;  %v590_v48 = vmul.f32 %v1294_v32, %v1294_v32 }
  0xf3   : > { %739 = vmatmul.mubr.f32.vlgmr.msra.gmra.mxu1 %v1292_v27  ;;  %v1296_v36 = vpop.eup %1295 }
  0xf4   : > { %1108 = vst [vmem:[%s1588_s13 + $0x18] sm:$0xff] %v1084_v34   ;;  %1309 = vtanh.f32 %v480_v35  ;;  %719 = vmatmul.mubr.f32.gmra.mxu0 %v1284_v12  ;;  %v593_v43 = vmul.f32 %v1296_v36, %v1296_v36 }
  0xf5   : > { %v1298_v38 = vpop.eup %1297  ;;  %723 = vmatprep.mubr.f32.mxu0 %v588_v37 }
  0xf6   : > { %v1089_v39 = vpack.c.bf16 %v1296_v36, %v1298_v38  ;;  %v592_v40 = vmul.f32 %v1298_v38, %v1298_v38 }
  0xf7   : > { %v1300_v41 = vpop.eup %1299 }
  0xf8   : > { %1109 = vst [vmem:[%s1588_s13 + $0x20] sm:$0xff] %v1089_v39   ;;  %743 = vmatprep.mubr.f32.mxu1 %v592_v40  ;;  %724 = vmatmul.mubr.f32.gmra.mxu0 %v1290_v23  ;;  %v595_v52 = vmul.f32 %v1300_v41, %v1300_v41 }
  0xf9   : > { %v1302_v44 = vpop.eup %1301  ;;  %744 = vmatmul.mubr.f32.gmra.mxu1 %v1298_v38  ;;  %728 = vmatprep.mubr.f32.mxu0 %v589_v42 }
  0xfa   : > { %v1094_v45 = vpack.c.bf16 %v1300_v41, %v1302_v44  ;;  %748 = vmatprep.mubr.f32.mxu1 %v593_v43  ;;  %v594_v46 = vmul.f32 %v1302_v44, %v1302_v44 }
  0xfb   : > { %v1304_v47 = vpop.eup %1303 }
  0xfc   : > { %1110 = vst [vmem:[%s1588_s13 + $0x28] sm:$0xff] %v1094_v45   ;;  %729 = vmatmul.mubr.f32.gmra.mxu0 %v1288_v20  ;;  %v597_v56 = vmul.f32 %v1304_v47, %v1304_v47 }
  0xfd   : > { %v1306_v49 = vpop.eup %1305  ;;  %749 = vmatmul.mubr.f32.gmra.mxu1 %v1296_v36  ;;  %733 = vmatprep.mubr.f32.mxu0 %v590_v48 }
  0xfe   : > { %v1099_v50 = vpack.c.bf16 %v1304_v47, %v1306_v49  ;;  %753 = vmatprep.mubr.f32.mxu1 %v594_v46  ;;  %v596_v55 = vmul.f32 %v1306_v49, %v1306_v49 }
  0xff   : > { %v1308_v51 = vpop.eup %1307 }
 0x100   : > { %1111 = vst [vmem:[%s1588_s13 + $0x30] sm:$0xff] %v1099_v50   ;;  %734 = vmatmul.mubr.f32.gmra.mxu0 %v1294_v32  ;;  %v599_v58 = vmul.f32 %v1308_v51, %v1308_v51 }
 0x101   : > { %v1310_v53 = vpop.eup %1309  ;;  %754 = vmatmul.mubr.f32.gmra.mxu1 %v1302_v44 }
 0x102   : > { %v1104_v54 = vpack.c.bf16 %v1308_v51, %v1310_v53  ;;  %758 = vmatprep.mubr.f32.mxu1 %v595_v52  ;;  %v598_v57 = vmul.f32 %v1310_v53, %v1310_v53 }
 0x104   : > { %1112 = vst [vmem:[%s1588_s13 + $0x38] sm:$0xff] %v1104_v54  }
 0x105   : > { %759 = vmatmul.mubr.f32.gmra.mxu1 %v1300_v41 }
 0x106   : > { %763 = vmatprep.mubr.f32.mxu1 %v596_v55 }
 0x109   : > { %764 = vmatmul.mubr.f32.gmra.mxu1 %v1306_v49 }
 0x10a   : > { %768 = vmatprep.mubr.f32.mxu1 %v597_v56 }
 0x10d   : > { %769 = vmatmul.mubr.f32.gmra.mxu1 %v1304_v47 }
 0x10e   : > { %773 = vmatprep.mubr.f32.mxu1 %v598_v57 }
 0x111   : > { %774 = vmatmul.mubr.f32.gmra.mxu1 %v1310_v53 }
 0x112   : > { %778 = vmatprep.mubr.f32.mxu1 %v599_v58 }
 0x115   : > { %779 = vmatmul.mubr.f32.gmra.mxu1 %v1308_v51 }
 0x1a8   : > { %v1163_v59 = vpop.f32.mrf.mxu0 }
 0x1aa   : > { %v1164_v61 = vpop.f32.mrf.mxu0 }
 0x1ab   : > { %v1165_v62 = vadd.f32 %v1164_v61, %v1163_v59 }
 0x1ac   : > { %v1166_v63 = vpop.f32.mrf.mxu0 }
 0x1ad   : > { %v706_v0 = vadd.f32 %v1165_v62, %v1608_v60 }
 0x1ae   : > { %v1167_v1 = vpop.f32.mrf.mxu0 }
 0x1af   : > { %v1032_v2 = vmul.f32 -1.442695, %v706_v0  ;;  %v1168_v3 = vadd.f32 %v1167_v1, %v1166_v63 }
 0x1b0   : > { %v1169_v4 = vpop.f32.mrf.mxu0 }
 0x1b1   : > { %1311 = vpow2.f32 %v1032_v2  ;;  %v711_v5 = vadd.f32 %v1168_v3, %v1608_v60 }
 0x1b2   : > { %v1170_v6 = vpop.f32.mrf.mxu0 }
 0x1b3   : > { %v1184_v7 = vpop.f32.mrf.mxu1  ;;  %v1033_v8 = vmul.f32 -1.442695, %v711_v5  ;;  %v1171_v9 = vadd.f32 %v1170_v6, %v1169_v4 }
 0x1b4   : > { %v1172_v10 = vpop.f32.mrf.mxu0 }
 0x1b5   : > { %v1185_v11 = vpop.f32.mrf.mxu1  ;;  %1313 = vpow2.f32 %v1033_v8  ;;  %v716_v12 = vadd.f32 %v1171_v9, %v1608_v60 }
 0x1b6   : > { %v1186_v13 = vadd.f32 %v1185_v11, %v1184_v7  ;;  %v1173_v14 = vpop.f32.mrf.mxu0 }
 0x1b7   : > { %v1034_v15 = vmul.f32 -1.442695, %v716_v12  ;;  %v1174_v17 = vadd.f32 %v1173_v14, %v1172_v10 }
 0x1b8   : > { %v741_v16 = vadd.f32 %v1186_v13, %v1608_v60  ;;  %v1175_v18 = vpop.f32.mrf.mxu0 }
 0x1b9   : > { %v1187_v19 = vpop.f32.mrf.mxu1  ;;  %1315 = vpow2.f32 %v1034_v15  ;;  %v721_v21 = vadd.f32 %v1174_v17, %v1608_v60 }
 0x1ba   : > { %v1039_v20 = vmul.f32 -1.442695, %v741_v16  ;;  %v1176_v22 = vpop.f32.mrf.mxu0 }
 0x1bb   : > { %v1188_v23 = vpop.f32.mrf.mxu1  ;;  %v1035_v24 = vmul.f32 -1.442695, %v721_v21  ;;  %v1177_v25 = vadd.f32 %v1176_v22, %v1175_v18 }
 0x1bc   : > { %1317 = vpow2.f32 %v1039_v20  ;;  %v1189_v26 = vadd.f32 %v1188_v23, %v1187_v19  ;;  %v1178_v27 = vpop.f32.mrf.mxu0 }
 0x1bd   : > { %v1190_v28 = vpop.f32.mrf.mxu1  ;;  %1319 = vpow2.f32 %v1035_v24  ;;  %v726_v29 = vadd.f32 %v1177_v25, %v1608_v60 }
 0x1be   : > { %v746_v30 = vadd.f32 %v1189_v26, %v1608_v60  ;;  %v1312_v31 = vpop.eup %1311  ;;  %v1179_v32 = vpop.f32.mrf.mxu0 }
 0x1bf   : > { %v1191_v33 = vpop.f32.mrf.mxu1  ;;  %v832_v34 = vadd.f32 1.0, %v1312_v31  ;;  %v1036_v35 = vmul.f32 -1.442695, %v726_v29  ;;  %v1180_v37 = vadd.f32 %v1179_v32, %v1178_v27 }
 0x1c0   : > { %v1040_v36 = vmul.f32 -1.442695, %v746_v30  ;;  %v1192_v38 = vadd.f32 %v1191_v33, %v1190_v28  ;;  %v1181_v39 = vpop.f32.mrf.mxu0 }
 0x1c1   : > { %v1193_v40 = vpop.f32.mrf.mxu1  ;;  %1321 = vrcp.f32 %v832_v34  ;;  %v731_v41 = vadd.f32 %v1180_v37, %v1608_v60 }
 0x1c2   : > { %v1314_v42 = vpop.eup %1313  ;;  %1323 = vpow2.f32 %v1036_v35  ;;  %v751_v43 = vadd.f32 %v1192_v38, %v1608_v60  ;;  %v1182_v44 = vpop.f32.mrf.mxu0 }
 0x1c3   : > { %v1194_v45 = vpop.f32.mrf.mxu1  ;;  %v833_v46 = vadd.f32 1.0, %v1314_v42  ;;  %1325 = vpow2.f32 %v1040_v36  ;;  %v1037_v47 = vmul.f32 -1.442695, %v731_v41  ;;  %v1183_v48 = vadd.f32 %v1182_v44, %v1181_v39 }
 0x1c4   : > { %v1041_v49 = vmul.f32 -1.442695, %v751_v43  ;;  %v1195_v50 = vadd.f32 %v1194_v45, %v1193_v40 }
 0x1c5   : > { %v1196_v51 = vpop.f32.mrf.mxu1  ;;  %1327 = vrcp.f32 %v833_v46  ;;  %v736_v52 = vadd.f32 %v1183_v48, %v1608_v60 }
 0x1c6   : > { %v1316_v53 = vpop.eup %1315  ;;  %1329 = vpow2.f32 %v1037_v47  ;;  %v756_v54 = vadd.f32 %v1195_v50, %v1608_v60 }
 0x1c7   : > { %v1197_v55 = vpop.f32.mrf.mxu1  ;;  %v834_v56 = vadd.f32 1.0, %v1316_v53  ;;  %1331 = vpow2.f32 %v1041_v49  ;;  %v1038_v57 = vmul.f32 -1.442695, %v736_v52 }
 0x1c8   : > { %v1198_v58 = vadd.f32 %v1197_v55, %v1196_v51  ;;  %v1042_v61 = vmul.f32 -1.442695, %v756_v54 }
 0x1c9   : > { %v1318_v59 = vpop.eup %1317  ;;  %v1199_v62 = vpop.f32.mrf.mxu1  ;;  %1333 = vrcp.f32 %v834_v56 }
 0x1ca   : > { %v839_v63 = vadd.f32 1.0, %v1318_v59  ;;  %v761_v0 = vadd.f32 %v1198_v58, %v1608_v60  ;;  %v1320_v1 = vpop.eup %1319  ;;  %1335 = vpow2.f32 %v1038_v57 }
 0x1cb   : > { %v1200_v2 = vpop.f32.mrf.mxu1  ;;  %v835_v3 = vadd.f32 1.0, %v1320_v1 }
 0x1cc   : > { %1337 = vrcp.f32 %v839_v63  ;;  %v1043_v4 = vmul.f32 -1.442695, %v761_v0  ;;  %v1201_v5 = vadd.f32 %v1200_v2, %v1199_v62 }
 0x1cd   : > { %1339 = vpow2.f32 %v1042_v61  ;;  %v1202_v6 = vpop.f32.mrf.mxu1 }
 0x1ce   : > { %1341 = vrcp.f32 %v835_v3  ;;  %v766_v7 = vadd.f32 %v1201_v5, %v1608_v60  ;;  %v1322_v8 = vpop.eup %1321 }
 0x1cf   : > { %1343 = vpow2.f32 %v1043_v4  ;;  %v1203_v9 = vpop.f32.mrf.mxu1  ;;  %v1324_v10 = vpop.eup %1323  ;;  %881 = vst.msk [vmem:[%s1627_s19] sm:$0xff] %vm880_vm1, %v1322_v8 }
 0x1d0   : > { %v1044_v11 = vmul.f32 -1.442695, %v766_v7  ;;  %v1204_v12 = vadd.f32 %v1203_v9, %v1202_v6  ;;  %v1326_v13 = vpop.eup %1325  ;;  %v836_v14 = vadd.f32 1.0, %v1324_v10 }
 0x1d1   : > { %v1205_v15 = vpop.f32.mrf.mxu1  ;;  %v840_v16 = vadd.f32 1.0, %v1326_v13 }
 0x1d2   : > { %1345 = vpow2.f32 %v1044_v11  ;;  %v771_v17 = vadd.f32 %v1204_v12, %v1608_v60  ;;  %v1328_v18 = vpop.eup %1327 }
 0x1d3   : > { %1347 = vrcp.f32 %v836_v14  ;;  %v1206_v19 = vpop.f32.mrf.mxu1  ;;  %v1330_v20 = vpop.eup %1329  ;;  %882 = vst.msk [vmem:[%s1627_s19 + $0x8] sm:$0xff] %vm880_vm1, %v1328_v18 }
 0x1d4   : > { %1349 = vrcp.f32 %v840_v16  ;;  %v1045_v21 = vmul.f32 -1.442695, %v771_v17  ;;  %v1207_v22 = vadd.f32 %v1206_v19, %v1205_v15  ;;  %v1332_v23 = vpop.eup %1331  ;;  %v837_v24 = vadd.f32 1.0, %v1330_v20 }
 0x1d5   : > { %v1208_v25 = vpop.f32.mrf.mxu1  ;;  %v841_v26 = vadd.f32 1.0, %v1332_v23 }
 0x1d6   : > { %1351 = vpow2.f32 %v1045_v21  ;;  %v776_v27 = vadd.f32 %v1207_v22, %v1608_v60  ;;  %v1334_v28 = vpop.eup %1333 }
 0x1d7   : > { %1353 = vrcp.f32 %v837_v24  ;;  %v1209_v29 = vpop.f32.mrf.mxu1  ;;  %v1336_v30 = vpop.eup %1335  ;;  %883 = vst.msk [vmem:[%s1627_s19 + $0x10] sm:$0xff] %vm880_vm1, %v1334_v28 }
 0x1d8   : > { %1355 = vrcp.f32 %v841_v26  ;;  %v1046_v31 = vmul.f32 -1.442695, %v776_v27  ;;  %v1210_v32 = vadd.f32 %v1209_v29, %v1208_v25  ;;  %v838_v34 = vadd.f32 1.0, %v1336_v30 }
 0x1d9   : > { %v1338_v33 = vpop.eup %1337 }
 0x1da   : > { %v1340_v35 = vpop.eup %1339  ;;  %888 = vst.msk [vmem:[%s1627_s19 + $0x38] sm:$0xff] %vm880_vm1, %v1338_v33  ;;  %1357 = vpow2.f32 %v1046_v31  ;;  %v781_v36 = vadd.f32 %v1210_v32, %v1608_v60 }
 0x1db   : > { %v1342_v37 = vpop.eup %1341  ;;  %1359 = vrcp.f32 %v838_v34  ;;  %v842_v38 = vadd.f32 1.0, %v1340_v35 }
 0x1dc   : > { %v1344_v39 = vpop.eup %1343  ;;  %884 = vst.msk [vmem:[%s1627_s19 + $0x18] sm:$0xff] %vm880_vm1, %v1342_v37  ;;  %v1047_v40 = vmul.f32 -1.442695, %v781_v36 }
 0x1dd   : > { %1361 = vrcp.f32 %v842_v38  ;;  %v843_v41 = vadd.f32 1.0, %v1344_v39 }
 0x1de   : > { %1363 = vpow2.f32 %v1047_v40 }
 0x1df   : > { %v1346_v42 = vpop.eup %1345  ;;  %1365 = vrcp.f32 %v843_v41 }
 0x1e0   : > { %v1348_v43 = vpop.eup %1347  ;;  %v844_v44 = vadd.f32 1.0, %v1346_v42 }
 0x1e1   : > { %v1350_v45 = vpop.eup %1349  ;;  %885 = vst.msk [vmem:[%s1627_s19 + $0x20] sm:$0xff] %vm880_vm1, %v1348_v43 }
 0x1e2   : > { %889 = vst.msk [vmem:[%s1627_s19 + $0x40] sm:$0xff] %vm880_vm1, %v1350_v45  ;;  %1367 = vrcp.f32 %v844_v44 }
 0x1e3   : > { %v1352_v60 = vpop.eup %1351 }
 0x1e4   : > { %v1354_v46 = vpop.eup %1353  ;;  %v845_v47 = vadd.f32 1.0, %v1352_v60 }
 0x1e5   : > { %v1356_v48 = vpop.eup %1355  ;;  %886 = vst.msk [vmem:[%s1627_s19 + $0x28] sm:$0xff] %vm880_vm1, %v1354_v46 }
 0x1e6   : > { %890 = vst.msk [vmem:[%s1627_s19 + $0x48] sm:$0xff] %vm880_vm1, %v1356_v48  ;;  %1369 = vrcp.f32 %v845_v47 }
 0x1e7   : > { %v1358_v49 = vpop.eup %1357 }
 0x1e8   : > { %v1360_v50 = vpop.eup %1359  ;;  %v846_v51 = vadd.f32 1.0, %v1358_v49 }
 0x1e9   : > { %887 = vst.msk [vmem:[%s1627_s19 + $0x30] sm:$0xff] %vm880_vm1, %v1360_v50 }
 0x1ea   : > { %v1362_v52 = vpop.eup %1361  ;;  %1371 = vrcp.f32 %v846_v51 }
 0x1eb   : > { %v1364_v53 = vpop.eup %1363  ;;  %891 = vst.msk [vmem:[%s1627_s19 + $0x50] sm:$0xff] %vm880_vm1, %v1362_v52 }
 0x1ec   : > { %v1366_v54 = vpop.eup %1365  ;;  %v847_v55 = vadd.f32 1.0, %v1364_v53 }
 0x1ed   : > { %892 = vst.msk [vmem:[%s1627_s19 + $0x58] sm:$0xff] %vm880_vm1, %v1366_v54 }
 0x1ee   : > { %1373 = vrcp.f32 %v847_v55 }
 0x1ef   : > { %v1368_v56 = vpop.eup %1367 }
 0x1f0   : > { %893 = vst.msk [vmem:[%s1627_s19 + $0x60] sm:$0xff] %vm880_vm1, %v1368_v56 }
 0x1f3   : > { %v1370_v57 = vpop.eup %1369 }
 0x1f4   : > { %894 = vst.msk [vmem:[%s1627_s19 + $0x68] sm:$0xff] %vm880_vm1, %v1370_v57 }
 0x1f7   : > { %v1372_v58 = vpop.eup %1371 }
 0x1f8   : > { %895 = vst.msk [vmem:[%s1627_s19 + $0x70] sm:$0xff] %vm880_vm1, %v1372_v58 }
 0x1fb   : > { %v1374_v59 = vpop.eup %1373 }
 0x1fc   : > { %896 = vst.msk [vmem:[%s1627_s19 + $0x78] sm:$0xff] %vm880_vm1, %v1374_v59 }
 0x1fd PF: > { %s17_s21 = sadd.s32 1, %s1381_s21  }
 0x1fe   : > { %p14_p4 = scmp.ge.s32.totalorder %s17_s21, 6  }
 0x200   :  { %16 = sbr.rel (!%p14_p4) target bundleno = 1 (0x1), region = 82 }

</bundles_post_ra>
